<compile_context>
chip_gen: v7x
topology: tpu7x:2x2x1
jax: 0.10.0
libtpu: 0.0.40
codegen_flags: <defaults>
</compile_context>

<pallas_src>
import functools

import numpy as np
import jax
import jax.numpy as jnp
from jax.experimental import pallas as pl
from jax.experimental.pallas import tpu as pltpu

_PREC = jax.lax.Precision.HIGH


# ----------------------------- Pallas mix kernel -----------------------------

def _make_mix_kernel(cin, cout, bb, has_bias):
    two_c = 2 * cout
    two_cin = 2 * cin

    def kernel(*refs):
        if has_bias:
            x_ref, wa_ref, wb_ref, b_ref, o_ref = refs
            init = b_ref[...]                            # (2*Cout, Mp), read once
        else:
            x_ref, wa_ref, wb_ref, o_ref = refs
            init = jnp.zeros((two_c, o_ref.shape[-1]), jnp.float32)

        # One f32 accumulator per batch element in this grid step.
        accs = [init] * bb

        # cin and bb are small compile-time constants -> fully unrolled.
        # Weight rows are loaded ONCE per input channel (hoisted out of the
        # batch loop); x rows are (1, Mp) slices broadcast across the 2*Cout
        # sublanes by the VPU multiply.
        for i in range(cin):
            wa_i = wa_ref[pl.ds(i * two_c, two_c), :]    # [ wr_i ; wi_i ]
            wb_i = wb_ref[pl.ds(i * two_c, two_c), :]    # [-wi_i ; wr_i ]
            for b in range(bb):
                xoff = b * two_cin
                xr = x_ref[pl.ds(xoff + i, 1), :]        # (1, Mp) Re row
                xi = x_ref[pl.ds(xoff + cin + i, 1), :]  # (1, Mp) Im row
                # rows [0:Cout]      : Re += xr*wr - xi*wi
                # rows [Cout:2*Cout] : Im += xr*wi + xi*wr
                accs[b] = accs[b] + xr * wa_i + xi * wb_i

        for b in range(bb):
            o_ref[pl.ds(b * two_c, two_c), :] = accs[b]

    return kernel


def _spectral_mix(x_packed, wa, wb, b_packed, *, cin, cout, bb):
    """x_packed: (G, bb*2*Cin, Mp); wa/wb: (Cin*2*Cout, Mp); b: (2*Cout, Mp)|None."""
    G, R, Mp = x_packed.shape
    two_c = 2 * cout
    out_rows = bb * two_c
    has_bias = b_packed is not None

    in_specs = [
        pl.BlockSpec((None, R, Mp), lambda g: (g, 0, 0)),       # x (per grid step)
        pl.BlockSpec((cin * two_c, Mp), lambda g: (0, 0)),      # wa (VMEM resident)
        pl.BlockSpec((cin * two_c, Mp), lambda g: (0, 0)),      # wb (VMEM resident)
    ]
    args = [x_packed, wa, wb]
    if has_bias:
        in_specs.append(pl.BlockSpec((two_c, Mp), lambda g: (0, 0)))
        args.append(b_packed)

    # NOTE (FNO-scale channels): at Cin=Cout>=64 the resident f32 wa+wb
    # (2*Cin*2*Cout*Mp*4 B, e.g. ~42 MiB at M~640) no longer fit v7x's 64 MiB
    # VMEM once double-buffered x/out are added.  Plan: bf16-resident weights
    # with f32 accumulation (v6e/v7x; on v5e upcast once per tile instead, its
    # VPU has no bf16 ALUs) or a Cout grid axis so only a weight slice is
    # resident, plus a matching vmem_limit_bytes.  Trivial at 4x4 channels.
    return pl.pallas_call(
        _make_mix_kernel(cin, cout, bb, has_bias),
        out_shape=jax.ShapeDtypeStruct((G, out_rows, Mp), jnp.float32),
        grid_spec=pltpu.PrefetchScalarGridSpec(
            num_scalar_prefetch=0,
            grid=(G,),
            in_specs=in_specs,
            out_specs=pl.BlockSpec((None, out_rows, Mp), lambda g: (g, 0, 0)),
        ),
        compiler_params=pltpu.CompilerParams(
            dimension_semantics=("parallel",),
            vmem_limit_bytes=32 * 1024 * 1024),
    )(*args)


# --------------------------- generation-aware batching -----------------------

def _tensorcores_per_device():
    """Best-effort count of TensorCores behind one JAX device."""
    try:
        kind = jax.devices()[0].device_kind.lower()
    except Exception:
        return 1
    # Chips that expose 2 TensorCores behind one device (megacore / v7x).
    return 2 if any(t in kind for t in ("v4", "v5p", "v7", "7x")) else 1


def _pick_bb(B, cin, cout, m_pad):
    """Batch elements per grid step (generation aware, VMEM bounded)."""
    # Double-buffered per-step x/out tiles per batch element, f32.
    per_b = 2 * (2 * cin + 2 * cout) * m_pad * 4
    cap = max(1, min(B, (8 << 20) // max(per_b, 1)))          # ~8 MiB budget
    n_tc = _tensorcores_per_device()
    if n_tc > 1:
        # Keep >= n_tc grid steps so the "parallel" batch axis shards across
        # the chip's TensorCores (bb=B would collapse the grid to one step).
        cap = min(cap, max(1, B // n_tc))
    bb = 1
    for d in range(1, cap + 1):
        if B % d == 0:
            bb = d
    return bb


# --------------------- truncated DFT matrices (trace-time) -------------------

def _fwd_dft_mats(H, W, Hp, Wp, sx, sy):
    """Truncated rfft2 of a real (H, W) signal zero-padded to (Hp, Wp); only
    modes [0:sx, 0:sy] are produced, as two fused real block operators:
      x @ FW2 -> [t_re | t_im] along the last axis, then CH4 (2, sx, H, 2)
      applies the H-stage complex rotation producing packed [Re; Im]."""
    aw = 2.0 * np.pi * np.outer(np.arange(W), np.arange(sy)) / Wp
    fw2 = np.concatenate([np.cos(aw), -np.sin(aw)], axis=1)           # (W, 2K)
    ah = 2.0 * np.pi * np.outer(np.arange(sx), np.arange(H)) / Hp
    ch, sh = np.cos(ah), np.sin(ah)
    ch4 = np.empty((2, sx, H, 2), np.float32)
    ch4[0, :, :, 0] = ch        # Re <- t_re
    ch4[0, :, :, 1] = sh        # Re <- t_im
    ch4[1, :, :, 0] = -sh       # Im <- t_re
    ch4[1, :, :, 1] = ch        # Im <- t_im
    return jnp.asarray(fw2, jnp.float32), jnp.asarray(ch4, jnp.float32)


def _inv_dft_mats(Hp, Wp, sx, sy, h_out, w_out):
    """irfft2 restricted to a spectrum that is zero outside [0:sx, 0:sy], as
    fused block operators BH4 (H-stage, complex) and AR2 (c2r W-stage).  The
    DC / Nyquist column scaling matches the c2r transform exactly."""
    ah = 2.0 * np.pi * np.outer(np.arange(h_out), np.arange(sx)) / Hp
    bc, bs = np.cos(ah) / Hp, np.sin(ah) / Hp
    bh4 = np.empty((2, h_out, 2, sx), np.float32)
    bh4[0, :, 0, :] = bc        # z_re <- y_re
    bh4[0, :, 1, :] = -bs       # z_re <- y_im
    bh4[1, :, 0, :] = bs        # z_im <- y_re
    bh4[1, :, 1, :] = bc        # z_im <- y_im
    aw = 2.0 * np.pi * np.outer(np.arange(sy), np.arange(w_out)) / Wp
    c = np.full((sy, 1), 2.0)
    c[0, 0] = 1.0
    if Wp % 2 == 0 and sy > Wp // 2:
        c[Wp // 2, 0] = 1.0                                           # Nyquist
    ar2 = np.stack([c * np.cos(aw) / Wp, -c * np.sin(aw) / Wp], axis=0)
    return jnp.asarray(bh4, jnp.float32), jnp.asarray(ar2, jnp.float32)


# -------------------------- one-time parameter packing -----------------------

def pack_fourier_conv2d_params(w_re, w_im, b_re=None, b_im=None, *, bias=True):
    """One-time packing of the complex weights/bias for the Pallas mix kernel.

    Done at module-init / parameter-update time, NOT per forward call:
      wa rows [i*2C : i*2C+C] = Re(W_i), rows [i*2C+C : (i+1)*2C] = Im(W_i)
      wb rows                 = -Im(W_i),                          Re(W_i)
    so that `acc += xr*wa + xi*wb` is the per-mode complex multiply-accumulate.
    The mode axis is padded to a multiple of 128 lanes (unmasked stores).
    """
    cin, cout, sx, sy = w_re.shape
    m = sx * sy
    m_pad = ((m + 127) // 128) * 128
    wr = w_re.reshape(cin, cout, m).astype(jnp.float32)
    wi = w_im.reshape(cin, cout, m).astype(jnp.float32)
    wa = jnp.concatenate([wr, wi], axis=1).reshape(cin * 2 * cout, m)
    wb = jnp.concatenate([-wi, wr], axis=1).reshape(cin * 2 * cout, m)
    if bias:
        bp = jnp.concatenate(
            [b_re.reshape(cout, m), b_im.reshape(cout, m)], axis=0
        ).astype(jnp.float32)
    else:
        bp = None
    if m_pad != m:
        wa = jnp.pad(wa, ((0, 0), (0, m_pad - m)))
        wb = jnp.pad(wb, ((0, 0), (0, m_pad - m)))
        if bp is not None:
            bp = jnp.pad(bp, ((0, 0), (0, m_pad - m)))
    return wa, wb, bp


# --------------------------------- forward -----------------------------------

def fourier_conv2d(x, params, *, size_x, size_y, bias=True, periodic=False):
    """Forward pass matching FourierConv2d.forward (NCHW input).

    `params` is the output of pack_fourier_conv2d_params (packing hoisted out
    of the per-call path).
    """
    wa, wb, bp = params
    B, Cin, H, W = x.shape
    Cout = wa.shape[0] // (2 * Cin)
    M_pad = wa.shape[1]
    SX, K = size_x, size_y
    M = SX * K
    x = x.astype(jnp.float32)

    if not periodic:
        Hp, Wp = H + SX, W + K               # F.pad(x, [0, size_y, 0, size_x])
    else:
        Hp, Wp = H, W
    assert SX <= Hp and K <= Wp // 2 + 1, "retained modes exceed spectrum"
    assert wa.shape[0] == 2 * Cin * Cout and M_pad >= M

    # ---- truncated rfft2: two fused block-matrix einsums --------------------
    # TODO(synk): these (and the two inverse einsums below) could be folded
    # into the pallas_call itself for a single launch with no HBM
    # intermediates; kept as XLA dots to avoid batched-dot / relayout lowering
    # risk at the 16-32 point sizes involved.
    fw2, ch4 = _fwd_dft_mats(H, W, Hp, Wp, SX, K)
    t = jnp.einsum('bihw,wq->bihq', x, fw2, precision=_PREC)        # (B,Ci,H,2K)
    t5 = t.reshape(B, Cin, H, 2, K)                                 # q -> (re/im, k)
    xp = jnp.einsum('rxhs,bihsk->brixk', ch4, t5, precision=_PREC)  # (B,2,Ci,SX,K)
    x_packed = xp.reshape(B, 2 * Cin, M)                            # contiguous
    if M_pad != M:
        x_packed = jnp.pad(x_packed, ((0, 0), (0, 0), (0, M_pad - M)))

    # ---- per-mode complex channel mix (Pallas) -------------------------------
    bb = _pick_bb(B, Cin, Cout, M_pad)
    x_packed = x_packed.reshape(B // bb, bb * 2 * Cin, M_pad)
    b_arg = bp if (bias and bp is not None) else None
    y = _spectral_mix(x_packed, wa, wb, b_arg, cin=Cin, cout=Cout, bb=bb)
    y = y.reshape(B, 2 * Cout, M_pad)
    if M_pad != M:
        y = y[..., :M]
    y5 = y.reshape(B, 2, Cout, SX, K)                               # contiguous

    # ---- truncated irfft2: two fused block-matrix einsums --------------------
    h_out = SX if not periodic else Hp
    w_out = K if not periodic else Wp
    bh4, ar2 = _inv_dft_mats(Hp, Wp, SX, K, h_out, w_out)
    z = jnp.einsum('shrx,broxk->bsohk', bh4, y5, precision=_PREC)   # (B,2,Co,h,K)
    out = jnp.einsum('bsohk,skw->bohw', z, ar2, precision=_PREC)    # (B,Co,h,w)
    return out


# ------------------------------ FFT reference --------------------------------

def _reference(x, w_re, w_im, b_re, b_im, *, size_x, size_y, bias, periodic):
    """Pure-JAX FFT-based reference replicating the PyTorch forward exactly."""
    if not periodic:
        x = jnp.pad(x, ((0, 0), (0, 0), (0, size_x), (0, size_y)))
    Hp, Wp = x.shape[-2], x.shape[-1]
    x_ft = jnp.fft.rfft2(x)
    w_c = w_re + 1j * w_im
    mixed = jnp.einsum('bixy,ioxy->boxy', x_ft[:, :, :size_x, :size_y], w_c,
                       precision=jax.lax.Precision.HIGHEST)
    if bias:
        mixed = mixed + (b_re + 1j * b_im)
    out_ft = jnp.zeros((x.shape[0], w_re.shape[1], Hp, Wp // 2 + 1),
                       dtype=jnp.complex64)
    out_ft = out_ft.at[:, :, :size_x, :size_y].set(mixed)
    out = jnp.fft.irfft2(out_ft, s=(Hp, Wp))
    if not periodic:
        out = out[..., :size_x, :size_y]
    return out


if __name__ == "__main__":
    # Module config (non-periodic => size_x/size_y kept as-is).
    in_channels, out_channels = 4, 4
    size_x, size_y = 16, 16
    bias, periodic = True, False

    key = jax.random.PRNGKey(0)
    kx, kwr, kwi, kbr, kbi = jax.random.split(key, 5)

    # Input: NCHW, spatial dims equal to (size_x, size_y) as in the FNO usage.
    x = jax.random.normal(kx, (2, in_channels, size_x, size_y), jnp.float32)

    # Parameter init mirroring torch.rand(..., dtype=cfloat) scaling.
    w_scale = 1.0 / (in_channels * out_channels)
    b_scale = 1.0 / out_channels
    w_re = w_scale * jax.random.uniform(
        kwr, (in_channels, out_channels, size_x, size_y), jnp.float32)
    w_im = w_scale * jax.random.uniform(
        kwi, (in_channels, out_channels, size_x, size_y), jnp.float32)
    b_re = b_scale * jax.random.uniform(
        kbr, (out_channels, size_x, size_y), jnp.float32)
    b_im = b_scale * jax.random.uniform(
        kbi, (out_channels, size_x, size_y), jnp.float32)

    # One-time parameter packing (module-init / param-update rate).
    params = pack_fourier_conv2d_params(w_re, w_im, b_re, b_im, bias=bias)

    fwd = jax.jit(functools.partial(
        fourier_conv2d, size_x=size_x, size_y=size_y,
        bias=bias, periodic=periodic))
    out = jax.block_until_ready(fwd(x, params))

    ref = _reference(x, w_re, w_im, b_re, b_im, size_x=size_x, size_y=size_y,
                     bias=bias, periodic=periodic)
    assert out.shape == (2, out_channels, size_x, size_y), out.shape
    assert jnp.allclose(out, ref, atol=1e-3, rtol=1e-3), "mismatch vs reference"

    print("KERNEL_OK")
</pallas_src>

<mosaic_0001>
module attributes {stable_mosaic.version = 11 : i64} {
  func.func @kernel(%arg0: i32, %arg1: memref<1x16x256xf32, #tpu.memory_space<vmem>>, %arg2: memref<32x256xf32, #tpu.memory_space<vmem>>, %arg3: memref<32x256xf32, #tpu.memory_space<vmem>>, %arg4: memref<8x256xf32, #tpu.memory_space<vmem>>, %arg5: memref<1x16x256xf32, #tpu.memory_space<vmem>>) attributes {dimension_semantics = [#tpu.dimension_semantics<parallel>], iteration_bounds = array<i64: 1>, scalar_prefetch = 0 : i64, scratch_operands = 0 : i64, tpu.core_type = #tpu.core_type<tc>, window_params = [{transform_indices = @transform_0, window_bounds = array<i64: 1, 16, 256>}, {pipeline_mode = #tpu.pipeline_mode<synchronous>, transform_indices = @transform_1, window_bounds = array<i64: 32, 256>}, {pipeline_mode = #tpu.pipeline_mode<synchronous>, transform_indices = @transform_2, window_bounds = array<i64: 32, 256>}, {pipeline_mode = #tpu.pipeline_mode<synchronous>, transform_indices = @transform_3, window_bounds = array<i64: 8, 256>}, {transform_indices = @transform_4, window_bounds = array<i64: 1, 16, 256>}]} {
    %c0 = arith.constant 0 : index
    %c0_0 = arith.constant 0 : index
    %0 = vector.load %arg4[%c0, %c0_0] : memref<8x256xf32, #tpu.memory_space<vmem>>, vector<8x256xf32>
    %c0_1 = arith.constant 0 : index
    %c0_2 = arith.constant 0 : index
    %1 = vector.load %arg2[%c0_1, %c0_2] : memref<32x256xf32, #tpu.memory_space<vmem>>, vector<8x256xf32>
    %c0_3 = arith.constant 0 : index
    %c0_4 = arith.constant 0 : index
    %2 = vector.load %arg3[%c0_3, %c0_4] : memref<32x256xf32, #tpu.memory_space<vmem>>, vector<8x256xf32>
    %c0_5 = arith.constant 0 : index
    %c0_6 = arith.constant 0 : index
    %c0_7 = arith.constant 0 : index
    %3 = vector.load %arg1[%c0_5, %c0_6, %c0_7] : memref<1x16x256xf32, #tpu.memory_space<vmem>>, vector<1x1x256xf32>
    %4 = vector.shape_cast %3 : vector<1x1x256xf32> to vector<1x256xf32>
    %c0_8 = arith.constant 0 : index
    %c4 = arith.constant 4 : index
    %c0_9 = arith.constant 0 : index
    %5 = vector.load %arg1[%c0_8, %c4, %c0_9] : memref<1x16x256xf32, #tpu.memory_space<vmem>>, vector<1x1x256xf32>
    %6 = vector.shape_cast %5 : vector<1x1x256xf32> to vector<1x256xf32>
    %7 = vector.broadcast %4 : vector<1x256xf32> to vector<8x256xf32>
    %8 = arith.mulf %7, %1 : vector<8x256xf32>
    %9 = arith.addf %0, %8 : vector<8x256xf32>
    %10 = vector.broadcast %6 : vector<1x256xf32> to vector<8x256xf32>
    %11 = arith.mulf %10, %2 : vector<8x256xf32>
    %12 = arith.addf %9, %11 : vector<8x256xf32>
    %c0_10 = arith.constant 0 : index
    %c8 = arith.constant 8 : index
    %c0_11 = arith.constant 0 : index
    %13 = vector.load %arg1[%c0_10, %c8, %c0_11] : memref<1x16x256xf32, #tpu.memory_space<vmem>>, vector<1x1x256xf32>
    %14 = vector.shape_cast %13 : vector<1x1x256xf32> to vector<1x256xf32>
    %c0_12 = arith.constant 0 : index
    %c12 = arith.constant 12 : index
    %c0_13 = arith.constant 0 : index
    %15 = vector.load %arg1[%c0_12, %c12, %c0_13] : memref<1x16x256xf32, #tpu.memory_space<vmem>>, vector<1x1x256xf32>
    %16 = vector.shape_cast %15 : vector<1x1x256xf32> to vector<1x256xf32>
    %17 = vector.broadcast %14 : vector<1x256xf32> to vector<8x256xf32>
    %18 = arith.mulf %17, %1 : vector<8x256xf32>
    %19 = arith.addf %0, %18 : vector<8x256xf32>
    %20 = vector.broadcast %16 : vector<1x256xf32> to vector<8x256xf32>
    %21 = arith.mulf %20, %2 : vector<8x256xf32>
    %22 = arith.addf %19, %21 : vector<8x256xf32>
    %c8_14 = arith.constant 8 : index
    %c0_15 = arith.constant 0 : index
    %23 = vector.load %arg2[%c8_14, %c0_15] : memref<32x256xf32, #tpu.memory_space<vmem>>, vector<8x256xf32>
    %c8_16 = arith.constant 8 : index
    %c0_17 = arith.constant 0 : index
    %24 = vector.load %arg3[%c8_16, %c0_17] : memref<32x256xf32, #tpu.memory_space<vmem>>, vector<8x256xf32>
    %c0_18 = arith.constant 0 : index
    %c1 = arith.constant 1 : index
    %c0_19 = arith.constant 0 : index
    %25 = vector.load %arg1[%c0_18, %c1, %c0_19] : memref<1x16x256xf32, #tpu.memory_space<vmem>>, vector<1x1x256xf32>
    %26 = vector.shape_cast %25 : vector<1x1x256xf32> to vector<1x256xf32>
    %c0_20 = arith.constant 0 : index
    %c5 = arith.constant 5 : index
    %c0_21 = arith.constant 0 : index
    %27 = vector.load %arg1[%c0_20, %c5, %c0_21] : memref<1x16x256xf32, #tpu.memory_space<vmem>>, vector<1x1x256xf32>
    %28 = vector.shape_cast %27 : vector<1x1x256xf32> to vector<1x256xf32>
    %29 = vector.broadcast %26 : vector<1x256xf32> to vector<8x256xf32>
    %30 = arith.mulf %29, %23 : vector<8x256xf32>
    %31 = arith.addf %12, %30 : vector<8x256xf32>
    %32 = vector.broadcast %28 : vector<1x256xf32> to vector<8x256xf32>
    %33 = arith.mulf %32, %24 : vector<8x256xf32>
    %34 = arith.addf %31, %33 : vector<8x256xf32>
    %c0_22 = arith.constant 0 : index
    %c9 = arith.constant 9 : index
    %c0_23 = arith.constant 0 : index
    %35 = vector.load %arg1[%c0_22, %c9, %c0_23] : memref<1x16x256xf32, #tpu.memory_space<vmem>>, vector<1x1x256xf32>
    %36 = vector.shape_cast %35 : vector<1x1x256xf32> to vector<1x256xf32>
    %c0_24 = arith.constant 0 : index
    %c13 = arith.constant 13 : index
    %c0_25 = arith.constant 0 : index
    %37 = vector.load %arg1[%c0_24, %c13, %c0_25] : memref<1x16x256xf32, #tpu.memory_space<vmem>>, vector<1x1x256xf32>
    %38 = vector.shape_cast %37 : vector<1x1x256xf32> to vector<1x256xf32>
    %39 = vector.broadcast %36 : vector<1x256xf32> to vector<8x256xf32>
    %40 = arith.mulf %39, %23 : vector<8x256xf32>
    %41 = arith.addf %22, %40 : vector<8x256xf32>
    %42 = vector.broadcast %38 : vector<1x256xf32> to vector<8x256xf32>
    %43 = arith.mulf %42, %24 : vector<8x256xf32>
    %44 = arith.addf %41, %43 : vector<8x256xf32>
    %c16 = arith.constant 16 : index
    %c0_26 = arith.constant 0 : index
    %45 = vector.load %arg2[%c16, %c0_26] : memref<32x256xf32, #tpu.memory_space<vmem>>, vector<8x256xf32>
    %c16_27 = arith.constant 16 : index
    %c0_28 = arith.constant 0 : index
    %46 = vector.load %arg3[%c16_27, %c0_28] : memref<32x256xf32, #tpu.memory_space<vmem>>, vector<8x256xf32>
    %c0_29 = arith.constant 0 : index
    %c2 = arith.constant 2 : index
    %c0_30 = arith.constant 0 : index
    %47 = vector.load %arg1[%c0_29, %c2, %c0_30] : memref<1x16x256xf32, #tpu.memory_space<vmem>>, vector<1x1x256xf32>
    %48 = vector.shape_cast %47 : vector<1x1x256xf32> to vector<1x256xf32>
    %c0_31 = arith.constant 0 : index
    %c6 = arith.constant 6 : index
    %c0_32 = arith.constant 0 : index
    %49 = vector.load %arg1[%c0_31, %c6, %c0_32] : memref<1x16x256xf32, #tpu.memory_space<vmem>>, vector<1x1x256xf32>
    %50 = vector.shape_cast %49 : vector<1x1x256xf32> to vector<1x256xf32>
    %51 = vector.broadcast %48 : vector<1x256xf32> to vector<8x256xf32>
    %52 = arith.mulf %51, %45 : vector<8x256xf32>
    %53 = arith.addf %34, %52 : vector<8x256xf32>
    %54 = vector.broadcast %50 : vector<1x256xf32> to vector<8x256xf32>
    %55 = arith.mulf %54, %46 : vector<8x256xf32>
    %56 = arith.addf %53, %55 : vector<8x256xf32>
    %c0_33 = arith.constant 0 : index
    %c10 = arith.constant 10 : index
    %c0_34 = arith.constant 0 : index
    %57 = vector.load %arg1[%c0_33, %c10, %c0_34] : memref<1x16x256xf32, #tpu.memory_space<vmem>>, vector<1x1x256xf32>
    %58 = vector.shape_cast %57 : vector<1x1x256xf32> to vector<1x256xf32>
    %c0_35 = arith.constant 0 : index
    %c14 = arith.constant 14 : index
    %c0_36 = arith.constant 0 : index
    %59 = vector.load %arg1[%c0_35, %c14, %c0_36] : memref<1x16x256xf32, #tpu.memory_space<vmem>>, vector<1x1x256xf32>
    %60 = vector.shape_cast %59 : vector<1x1x256xf32> to vector<1x256xf32>
    %61 = vector.broadcast %58 : vector<1x256xf32> to vector<8x256xf32>
    %62 = arith.mulf %61, %45 : vector<8x256xf32>
    %63 = arith.addf %44, %62 : vector<8x256xf32>
    %64 = vector.broadcast %60 : vector<1x256xf32> to vector<8x256xf32>
    %65 = arith.mulf %64, %46 : vector<8x256xf32>
    %66 = arith.addf %63, %65 : vector<8x256xf32>
    %c24 = arith.constant 24 : index
    %c0_37 = arith.constant 0 : index
    %67 = vector.load %arg2[%c24, %c0_37] : memref<32x256xf32, #tpu.memory_space<vmem>>, vector<8x256xf32>
    %c24_38 = arith.constant 24 : index
    %c0_39 = arith.constant 0 : index
    %68 = vector.load %arg3[%c24_38, %c0_39] : memref<32x256xf32, #tpu.memory_space<vmem>>, vector<8x256xf32>
    %c0_40 = arith.constant 0 : index
    %c3 = arith.constant 3 : index
    %c0_41 = arith.constant 0 : index
    %69 = vector.load %arg1[%c0_40, %c3, %c0_41] : memref<1x16x256xf32, #tpu.memory_space<vmem>>, vector<1x1x256xf32>
    %70 = vector.shape_cast %69 : vector<1x1x256xf32> to vector<1x256xf32>
    %c0_42 = arith.constant 0 : index
    %c7 = arith.constant 7 : index
    %c0_43 = arith.constant 0 : index
    %71 = vector.load %arg1[%c0_42, %c7, %c0_43] : memref<1x16x256xf32, #tpu.memory_space<vmem>>, vector<1x1x256xf32>
    %72 = vector.shape_cast %71 : vector<1x1x256xf32> to vector<1x256xf32>
    %73 = vector.broadcast %70 : vector<1x256xf32> to vector<8x256xf32>
    %74 = arith.mulf %73, %67 : vector<8x256xf32>
    %75 = arith.addf %56, %74 : vector<8x256xf32>
    %76 = vector.broadcast %72 : vector<1x256xf32> to vector<8x256xf32>
    %77 = arith.mulf %76, %68 : vector<8x256xf32>
    %78 = arith.addf %75, %77 : vector<8x256xf32>
    %c0_44 = arith.constant 0 : index
    %c11 = arith.constant 11 : index
    %c0_45 = arith.constant 0 : index
    %79 = vector.load %arg1[%c0_44, %c11, %c0_45] : memref<1x16x256xf32, #tpu.memory_space<vmem>>, vector<1x1x256xf32>
    %80 = vector.shape_cast %79 : vector<1x1x256xf32> to vector<1x256xf32>
    %c0_46 = arith.constant 0 : index
    %c15 = arith.constant 15 : index
    %c0_47 = arith.constant 0 : index
    %81 = vector.load %arg1[%c0_46, %c15, %c0_47] : memref<1x16x256xf32, #tpu.memory_space<vmem>>, vector<1x1x256xf32>
    %82 = vector.shape_cast %81 : vector<1x1x256xf32> to vector<1x256xf32>
    %83 = vector.broadcast %80 : vector<1x256xf32> to vector<8x256xf32>
    %84 = arith.mulf %83, %67 : vector<8x256xf32>
    %85 = arith.addf %66, %84 : vector<8x256xf32>
    %86 = vector.broadcast %82 : vector<1x256xf32> to vector<8x256xf32>
    %87 = arith.mulf %86, %68 : vector<8x256xf32>
    %88 = arith.addf %85, %87 : vector<8x256xf32>
    %c0_48 = arith.constant 0 : index
    %c0_49 = arith.constant 0 : index
    %c0_50 = arith.constant 0 : index
    %89 = vector.load %arg5[%c0_48, %c0_49, %c0_50] : memref<1x16x256xf32, #tpu.memory_space<vmem>>, vector<1x8x256xf32>
    %90 = vector.shape_cast %89 : vector<1x8x256xf32> to vector<8x256xf32>
    %91 = vector.shape_cast %78 : vector<8x256xf32> to vector<1x8x256xf32>
    tpu.vector_store %arg5[%c0_48, %c0_49, %c0_50], %91 {strides = array<i32>} : memref<1x16x256xf32, #tpu.memory_space<vmem>>, vector<1x8x256xf32>,
    %c0_51 = arith.constant 0 : index
    %c8_52 = arith.constant 8 : index
    %c0_53 = arith.constant 0 : index
    %92 = vector.load %arg5[%c0_51, %c8_52, %c0_53] : memref<1x16x256xf32, #tpu.memory_space<vmem>>, vector<1x8x256xf32>
    %93 = vector.shape_cast %92 : vector<1x8x256xf32> to vector<8x256xf32>
    %94 = vector.shape_cast %88 : vector<8x256xf32> to vector<1x8x256xf32>
    tpu.vector_store %arg5[%c0_51, %c8_52, %c0_53], %94 {strides = array<i32>} : memref<1x16x256xf32, #tpu.memory_space<vmem>>, vector<1x8x256xf32>,
    return
  }
  func.func @transform_0(%arg0: i32) -> (i32, i32, i32) {
    %c0_i32 = arith.constant 0 : i32
    %c0_i32_0 = arith.constant 0 : i32
    %c0_i32_1 = arith.constant 0 : i32
    return %arg0, %c0_i32, %c0_i32_0 : i32, i32, i32
  }
  func.func @transform_1(%arg0: i32) -> (i32, i32) {
    %c0_i32 = arith.constant 0 : i32
    %c0_i32_0 = arith.constant 0 : i32
    %c0_i32_1 = arith.constant 0 : i32
    return %c0_i32, %c0_i32_0 : i32, i32
  }
  func.func @transform_2(%arg0: i32) -> (i32, i32) {
    %c0_i32 = arith.constant 0 : i32
    %c0_i32_0 = arith.constant 0 : i32
    %c0_i32_1 = arith.constant 0 : i32
    return %c0_i32, %c0_i32_0 : i32, i32
  }
  func.func @transform_3(%arg0: i32) -> (i32, i32) {
    %c0_i32 = arith.constant 0 : i32
    %c0_i32_0 = arith.constant 0 : i32
    %c0_i32_1 = arith.constant 0 : i32
    return %c0_i32, %c0_i32_0 : i32, i32
  }
  func.func @transform_4(%arg0: i32) -> (i32, i32, i32) {
    %c0_i32 = arith.constant 0 : i32
    %c0_i32_0 = arith.constant 0 : i32
    %c0_i32_1 = arith.constant 0 : i32
    return %arg0, %c0_i32, %c0_i32_0 : i32, i32, i32
  }
}

</mosaic_0001>

<bundles_post_ra>
// kernel: fourier_conv2d.1
= control target key start
LH: loop header
LB: loop body
LE: loop exit
PB: predicated region body
PF: predicated region fallthrough
CT: control target
= control target key end

     0   :  { %v27_v0 = vlaneseq  ;;  %s584_s0 = inlined_call_operand.vmem [shape: f32[1,16,256], index: 0, kind: input, shape index: {}]   ;;  %s585_s1 = inlined_call_operand.vmem [shape: f32[32,256], index: 1, kind: input, shape index: {}]   ;;  %s586_s2 = inlined_call_operand.vmem [shape: f32[32,256], index: 2, kind: input, shape index: {}]   ;;  %s587_s3 = inlined_call_operand.vmem [shape: f32[8,256], index: 3, kind: input, shape index: {}]   ;;  %s588_s4 = inlined_call_operand.vmem [shape: f32[1,16,256], index: 4, kind: output, shape index: {}]  }
   0x1   :  { %v23_v1 = vld [vmem:[%s584_s0] ss:$8 sm:$0x3]  ;;  %v314_v2 = vld [vmem:[%s584_s0 + $0x4] ss:$8 sm:$0x3] }
   0x2   :  { %v28_v3 = vshrl.u32 %v27_v0, 7  ;;  %v317_v4 = vld [vmem:[%s584_s0 + $0x1] ss:$8 sm:$0x3]  ;;  %v398_v16 = vld [vmem:[%s585_s1 + $0x10] sm:$0xff]  ;;  %v472_v44 = vld [vmem:[%s585_s1 + $0x18] sm:$0xff] }
   0x3   :  { %v318_v5 = vld [vmem:[%s584_s0 + $0x5] ss:$8 sm:$0x3]  ;;  %v321_v7 = vld [vmem:[%s584_s0 + $0x2] ss:$8 sm:$0x3] }
   0x4   :  { %v366_v6 = vsub.s32 0, %v28_v3  ;;  %v19_v8 = vld [vmem:[%s585_s1] sm:$0xff]  ;;  %v412_v23 = vld [vmem:[%s586_s2 + $0x10] sm:$0xff]  ;;  %v440_v32 = vsub.s32 1, %v28_v3  ;;  %v453_v37 = vld [vmem:[%s585_s1 + $0x8] sm:$0xff] }
   0x5   :  { %v21_v9 = vld [vmem:[%s586_s2] sm:$0xff]  ;;  %v429_v27 = vld [vmem:[%s584_s0 + $0x10] ss:$8 sm:$0x3]  ;;  %v458_v38 = vld [vmem:[%s586_s2 + $0x8] sm:$0xff] }
   0x6   :  { %v380_v10 = vld [vmem:[%s584_s0 + $0x6] ss:$8 sm:$0x3]  ;;  %v30_v11 = vrot.slane %v23_v1, %v366_v6  ;;  %v45_v12 = vrot.slane %v314_v2, %v366_v6  ;;  %v102_v13 = vrot.slane %v317_v4, %v366_v6  ;;  %v388_v14 = vld [vmem:[%s584_s0 + $0x3] ss:$8 sm:$0x3]  ;;  %v117_v17 = vrot.slane %v318_v5, %v366_v6 }
   0x7   :  { %v393_v15 = vld [vmem:[%s587_s3] sm:$0xff]  ;;  %v174_v18 = vrot.slane %v321_v7, %v366_v6  ;;  %v189_v19 = vrot.slane %v380_v10, %v366_v6  ;;  %v246_v26 = vrot.slane %v388_v14, %v366_v6  ;;  %v436_v30 = vld [vmem:[%s585_s1 + $0x30] sm:$0xff]  ;;  %v64_v39 = vrot.slane %v429_v27, %v366_v6  ;;  %v477_v45 = vld [vmem:[%s586_s2 + $0x18] sm:$0xff] }
   0x8   :  { %v407_v20 = vld [vmem:[%s584_s0 + $0x7] ss:$8 sm:$0x3]  ;;  %v37_v21 = vmul.f32 %v30_v11, %v19_v8  ;;  %v52_v22 = vmul.f32 %v45_v12, %v21_v9  ;;  %v109_v29 = vmul.f32 %v102_v13, %v398_v16  ;;  %v445_v33 = vld [vmem:[%s584_s0 + $0x14] ss:$8 sm:$0x3]  ;;  %v124_v34 = vmul.f32 %v117_v17, %v412_v23 }
   0x9   :  { %v417_v24 = vld [vmem:[%s585_s1 + $0x20] sm:$0xff]  ;;  %v261_v31 = vrot.slane %v407_v20, %v366_v6  ;;  %v465_v41 = vld [vmem:[%s586_s2 + $0x30] sm:$0xff]  ;;  %v34_v42 = vrot.slane %v23_v1, %v440_v32  ;;  %v49_v43 = vrot.slane %v314_v2, %v440_v32  ;;  %v106_v46 = vrot.slane %v317_v4, %v440_v32  ;;  %v18_v48 = vld [vmem:[%s587_s3 + $0x8] sm:$0xff] }
   0xa   :  { %v422_v25 = vld [vmem:[%s586_s2 + $0x20] sm:$0xff]  ;;  %v39_v28 = vadd.f32 %v37_v21, %v393_v15  ;;  %v181_v35 = vmul.f32 %v174_v18, %v417_v24  ;;  %v253_v47 = vmul.f32 %v246_v26, %v436_v30  ;;  %v121_v49 = vrot.slane %v318_v5, %v440_v32  ;;  %v488_v50 = vld [vmem:[%s585_s1 + $0x28] sm:$0xff]  ;;  %v319_v53 = vld [vmem:[%s584_s0 + $0x11] ss:$8 sm:$0x3] }
   0xb   :  { %v196_v36 = vmul.f32 %v189_v19, %v422_v25  ;;  %v178_v51 = vrot.slane %v321_v7, %v440_v32  ;;  %v79_v52 = vrot.slane %v445_v33, %v366_v6  ;;  %v38_v55 = vmul.f32 %v34_v42, %v453_v37  ;;  %v320_v58 = vld [vmem:[%s584_s0 + $0x15] ss:$8 sm:$0x3]  ;;  %v506_v59 = vld [vmem:[%s584_s0 + $0x12] ss:$8 sm:$0x3] }
   0xc   :  { %v54_v40 = vadd.f32 %v52_v22, %v39_v28  ;;  %v53_v56 = vmul.f32 %v49_v43, %v458_v38  ;;  %v193_v57 = vrot.slane %v380_v10, %v440_v32  ;;  %v268_v60 = vmul.f32 %v261_v31, %v465_v41  ;;  %v514_v63 = vld [vmem:[%s586_s2 + $0x28] sm:$0xff]  ;;  %v522_v4 = vld [vmem:[%s585_s1 + $0x38] sm:$0xff] }
   0xd   :  { %v110_v61 = vmul.f32 %v106_v46, %v472_v44  ;;  %v125_v62 = vmul.f32 %v121_v49, %v477_v45  ;;  %v250_v0 = vrot.slane %v388_v14, %v440_v32  ;;  %v40_v2 = vadd.f32 %v38_v55, %v18_v48  ;;  %v324_v7 = vld [vmem:[%s584_s0 + $0x16] ss:$8 sm:$0x3] }
   0xe   :  { %v111_v54 = vadd.f32 %v109_v29, %v54_v40  ;;  %v182_v3 = vmul.f32 %v178_v51, %v488_v50  ;;  %v71_v5 = vmul.f32 %v64_v39, %v19_v8  ;;  %v86_v10 = vmul.f32 %v79_v52, %v21_v9  ;;  %v327_v8 = vld [vmem:[%s584_s0 + $0x13] ss:$8 sm:$0x3] }
   0xf   :  { %v136_v11 = vrot.slane %v319_v53, %v366_v6  ;;  %v151_v12 = vrot.slane %v320_v58, %v366_v6  ;;  %v208_v13 = vrot.slane %v506_v59, %v366_v6  ;;  %v55_v17 = vadd.f32 %v53_v56, %v40_v2 }
  0x10   :  { %v126_v1 = vadd.f32 %v124_v34, %v111_v54  ;;  %v197_v18 = vmul.f32 %v193_v57, %v514_v63  ;;  %v73_v19 = vadd.f32 %v71_v5, %v393_v15  ;;  %v254_v21 = vmul.f32 %v250_v0, %v522_v4  ;;  %v328_v15 = vld [vmem:[%s584_s0 + $0x17] ss:$8 sm:$0x3] }
  0x11   :  { %v265_v9 = vrot.slane %v407_v20, %v440_v32  ;;  %v143_v22 = vmul.f32 %v136_v11, %v398_v16  ;;  %v223_v26 = vrot.slane %v324_v7, %v366_v6  ;;  %v112_v29 = vadd.f32 %v110_v61, %v55_v17 }
  0x12   :  { %v183_v14 = vadd.f32 %v181_v35, %v126_v1  ;;  %v88_v31 = vadd.f32 %v86_v10, %v73_v19  ;;  %v158_v34 = vmul.f32 %v151_v12, %v412_v23  ;;  %v215_v35 = vmul.f32 %v208_v13, %v417_v24  ;;  %v237_v23 = vld [vmem:[%s586_s2 + $0x38] sm:$0xff] }
  0x13   :  { %v280_v39 = vrot.slane %v327_v8, %v366_v6  ;;  %v68_v20 = vrot.slane %v429_v27, %v440_v32  ;;  %v83_v16 = vrot.slane %v445_v33, %v440_v32  ;;  %v230_v43 = vmul.f32 %v223_v26, %v422_v25 }
  0x14   :  { %v198_v28 = vadd.f32 %v196_v36, %v183_v14  ;;  %v127_v36 = vadd.f32 %v125_v62, %v112_v29  ;;  %v145_v42 = vadd.f32 %v143_v22, %v88_v31  ;;  %v295_v46 = vrot.slane %v328_v15, %v366_v6 }
  0x15   :  { %v72_v24 = vmul.f32 %v68_v20, %v453_v37  ;;  %v87_v49 = vmul.f32 %v83_v16, %v458_v38  ;;  %v140_v27 = vrot.slane %v319_v53, %v440_v32  ;;  %v212_v55 = vrot.slane %v506_v59, %v440_v32 }
  0x16   :  { %v255_v40 = vadd.f32 %v253_v47, %v198_v28  ;;  %v184_v52 = vadd.f32 %v182_v3, %v127_v36  ;;  %v160_v33 = vadd.f32 %v158_v34, %v145_v42  ;;  %v155_v47 = vrot.slane %v320_v58, %v440_v32 }
  0x17   :  { %v74_v54 = vadd.f32 %v72_v24, %v18_v48  ;;  %v144_v25 = vmul.f32 %v140_v27, %v472_v44  ;;  %v269_v37 = vmul.f32 %v265_v9, %v237_v23  ;;  %v287_v53 = vmul.f32 %v280_v39, %v436_v30 }
  0x18   :  { %v270_v51 = vadd.f32 %v268_v60, %v255_v40  ;;  %v199_v6 = vadd.f32 %v197_v18, %v184_v52  ;;  %v217_v38 = vadd.f32 %v215_v35, %v160_v33  ;;  %v159_v57 = vmul.f32 %v155_v47, %v477_v45 }
  0x19   :  { %v89_v56 = vadd.f32 %v87_v49, %v74_v54  ;;  %v227_v58 = vrot.slane %v324_v7, %v440_v32  ;;  %v302_v44 = vmul.f32 %v295_v46, %v465_v41  ;;  %v216_v59 = vmul.f32 %v212_v55, %v488_v50 }
  0x1a   :  { %306 = vst [vmem:[%s588_s4] sm:$0xff] %v270_v51  ;;  %v256_v48 = vadd.f32 %v254_v21, %v199_v6  ;;  %v232_v60 = vadd.f32 %v230_v43, %v217_v38  ;;  %v284_v62 = vrot.slane %v327_v8, %v440_v32  ;;  %v299_v30 = vrot.slane %v328_v15, %v440_v32 }
  0x1b   :  { %v146_v61 = vadd.f32 %v144_v25, %v89_v56  ;;  %v231_v3 = vmul.f32 %v227_v58, %v514_v63 }
  0x1c   :  { %v271_v0 = vadd.f32 %v269_v37, %v256_v48  ;;  %v289_v1 = vadd.f32 %v287_v53, %v232_v60  ;;  %v288_v41 = vmul.f32 %v284_v62, %v522_v4  ;;  %v303_v7 = vmul.f32 %v299_v30, %v237_v23 }
  0x1d   :  { %v161_v2 = vadd.f32 %v159_v57, %v146_v61 }
  0x1e   :  { %307 = vst [vmem:[%s588_s4 + $0x8] sm:$0xff] %v271_v0  ;;  %v304_v45 = vadd.f32 %v302_v44, %v289_v1 }
  0x1f   :  { %v218_v5 = vadd.f32 %v216_v59, %v161_v2 }
  0x20   :  { %308 = vst [vmem:[%s588_s4 + $0x10] sm:$0xff] %v304_v45 }
  0x21   :  { %v233_v50 = vadd.f32 %v231_v3, %v218_v5 }
  0x23   :  { %v290_v10 = vadd.f32 %v288_v41, %v233_v50 }
  0x25   :  { %v305_v11 = vadd.f32 %v303_v7, %v290_v10 }
  0x27   :  { %309 = vst [vmem:[%s588_s4 + $0x18] sm:$0xff] %v305_v11 }

</bundles_post_ra>
